<compile_context>
chip_gen: v7x
topology: tpu7x:2x2x1
jax: 0.10.0
libtpu: 0.0.40
codegen_flags: <defaults>
</compile_context>

<pallas_src>
import functools

import jax
import jax.numpy as jnp
from jax.experimental import pallas as pl
from jax.experimental.pallas import tpu as pltpu


ACT_DTYPE = jnp.bfloat16          # inter-kernel activations in HBM
WGT_DTYPE = jnp.bfloat16          # matmul weights in HBM
_VMEM_LIMIT = 48 * 1024 * 1024    # <= v7x 64 MiB/TC; v5e/v6e have 128 MiB headroom


# -----------------------------------------------------------------------------
# Fused (LayerNorm?) + matmul + bias (+ GELU?) (+ residual?) kernel
#   grid = (M/tm, N/tn); LN'd bf16 x tile cached in VMEM scratch across j tiles
# -----------------------------------------------------------------------------
def _fused_linear_kernel(*refs, use_ln, use_res, activation, ln_eps):
    idx = 0
    x_ref = refs[idx]; idx += 1
    if use_ln:
        g_ref = refs[idx]; bln_ref = refs[idx + 1]; idx += 2
    w_ref = refs[idx]; b_ref = refs[idx + 1]; idx += 2
    if use_res:
        res_ref = refs[idx]; idx += 1
    o_ref = refs[idx]; idx += 1
    xn_ref = refs[idx]                                    # VMEM scratch (tm, K) bf16

    # LayerNorm + f32->bf16 cast are done once per row tile (j == 0) and reused
    # for every output-column tile j (j axis is "arbitrary", so per-core the
    # j loop is sequential and the scratch stays valid).
    @pl.when(pl.program_id(1) == 0)
    def _():
        x = x_ref[...].astype(jnp.float32)                # (tm, K)
        if use_ln:
            mean = jnp.mean(x, axis=-1, keepdims=True)
            var = jnp.mean(jnp.square(x - mean), axis=-1, keepdims=True)
            x = (x - mean) * jax.lax.rsqrt(var + ln_eps)
            x = x * g_ref[...].astype(jnp.float32) + bln_ref[...].astype(jnp.float32)
        xn_ref[...] = x.astype(xn_ref.dtype)

    # bf16 x bf16 on the MXU, f32 accumulation.
    y = jnp.dot(xn_ref[...], w_ref[...], preferred_element_type=jnp.float32)  # (tm, tn)
    y = y + b_ref[...].astype(jnp.float32)
    if activation == "gelu":
        # TODO(synk): approximate=True (tanh) would halve EUP work on v5e, but
        # changes numerics vs nn.GELU() (exact erf) -- keep exact.
        y = jax.nn.gelu(y, approximate=False)
    if use_res:
        y = y + res_ref[...].astype(jnp.float32)
    o_ref[...] = y.astype(o_ref.dtype)


def fused_linear(x, w, b, *, ln=None, residual=None, activation=None,
                 tm_target=512, tn_target=512, ln_eps=1e-6, out_dtype=None):
    """y = [residual + ] act( LN?(x) @ w + b ).  Row/col tiled, full-K blocks."""
    m, k = x.shape
    k2, n = w.shape
    assert k == k2
    out_dtype = x.dtype if out_dtype is None else out_dtype
    tm = m if m <= tm_target else tm_target               # tm_target % 8 == 0
    tn = n if n <= tn_target else tn_target               # tn_target % 128 == 0
    grid = (pl.cdiv(m, tm), pl.cdiv(n, tn))

    inputs = [x]
    in_specs = [pl.BlockSpec((tm, k), lambda i, j: (i, 0))]
    if ln is not None:
        gamma, beta = ln
        inputs += [gamma.reshape(1, k), beta.reshape(1, k)]
        in_specs += [pl.BlockSpec((1, k), lambda i, j: (0, 0)),
                     pl.BlockSpec((1, k), lambda i, j: (0, 0))]
    inputs += [w, b.reshape(1, n)]
    in_specs += [pl.BlockSpec((k, tn), lambda i, j: (0, j)),
                 pl.BlockSpec((1, tn), lambda i, j: (0, j))]
    if residual is not None:
        inputs += [residual]
        in_specs += [pl.BlockSpec((tm, tn), lambda i, j: (i, j))]

    kern = functools.partial(
        _fused_linear_kernel,
        use_ln=ln is not None,
        use_res=residual is not None,
        activation=activation,
        ln_eps=ln_eps,
    )
    return pl.pallas_call(
        kern,
        out_shape=jax.ShapeDtypeStruct((m, n), out_dtype),
        grid=grid,
        in_specs=in_specs,
        out_specs=pl.BlockSpec((tm, tn), lambda i, j: (i, j)),
        scratch_shapes=[pltpu.VMEM((tm, k), jnp.bfloat16)],
        compiler_params=pltpu.CompilerParams(
            dimension_semantics=("parallel", "arbitrary"),
            vmem_limit_bytes=_VMEM_LIMIT),
    )(*inputs)


# -----------------------------------------------------------------------------
# Fused multi-head attention + output projection + residual kernel
#   one batch element (all heads) per grid step; head-concat in VMEM, then a
#   single full-K projection matmul with bias + residual folded in.
# -----------------------------------------------------------------------------
def _attn_proj_kernel(qkv_ref, res_ref, pw_ref, pb_ref, o_ref, *,
                      num_heads, scale, dim):
    qkv = qkv_ref[0]                                      # (T, 3D) bf16
    dh = dim // num_heads
    heads = []
    for h in range(num_heads):                            # static unroll over heads
        q = qkv[:, h * dh:(h + 1) * dh]                   # (T, dh)
        k = qkv[:, dim + h * dh: dim + (h + 1) * dh]      # (T, dh)
        v = qkv[:, 2 * dim + h * dh: 2 * dim + (h + 1) * dh]
        s = jax.lax.dot_general(q, k, (((1,), (1,)), ((), ())),
                                preferred_element_type=jnp.float32) * scale   # (T, T)
        s = s - jnp.max(s, axis=-1, keepdims=True)
        p = jnp.exp(s)
        p = p * pl.reciprocal(jnp.sum(p, axis=-1, keepdims=True), approx=True)
        heads.append(jnp.dot(p.astype(jnp.bfloat16), v,
                             preferred_element_type=jnp.float32))             # (T, dh)
    # concat(heads) -> ONE full-K projection matmul (+ bias + residual).
    o_all = jnp.concatenate(heads, axis=-1).astype(jnp.bfloat16)              # (T, D)
    y = jnp.dot(o_all, pw_ref[...], preferred_element_type=jnp.float32)       # (T, D)
    y = y + pb_ref[...].astype(jnp.float32) + res_ref[0].astype(jnp.float32)
    o_ref[0] = y.astype(o_ref.dtype)


def pallas_attention_block(qkv, x_res, proj_w, proj_b, *, num_heads, scale):
    b, t, d3 = qkv.shape
    d = d3 // 3
    assert d3 == 3 * d and x_res.shape == (b, t, d)
    kern = functools.partial(_attn_proj_kernel,
                             num_heads=num_heads, scale=scale, dim=d)
    return pl.pallas_call(
        kern,
        out_shape=jax.ShapeDtypeStruct((b, t, d), x_res.dtype),
        grid=(b,),
        in_specs=[
            pl.BlockSpec((1, t, d3), lambda i: (i, 0, 0)),
            pl.BlockSpec((1, t, d), lambda i: (i, 0, 0)),
            pl.BlockSpec((d, d), lambda i: (0, 0)),
            pl.BlockSpec((1, d), lambda i: (0, 0)),
        ],
        out_specs=pl.BlockSpec((1, t, d), lambda i: (i, 0, 0)),
        compiler_params=pltpu.CompilerParams(
            dimension_semantics=("parallel",),
            vmem_limit_bytes=_VMEM_LIMIT),
    )(qkv, x_res, proj_w, proj_b.reshape(1, d))


# -----------------------------------------------------------------------------
# ViT forward_features (trimmed blocks; norm/fc_norm/head removed)
# -----------------------------------------------------------------------------
def transformer_block(x, p, num_heads):
    b, t, d = x.shape
    dh = d // num_heads
    x2 = x.reshape(b * t, d)

    # --- attention branch: x + proj(attn(norm1(x))) --- (2 fused pallas_calls)
    qkv = fused_linear(x2, p["qkv_w"], p["qkv_b"],
                       ln=(p["ln1_g"], p["ln1_b"]))           # (B*T, 3D) bf16
    x = pallas_attention_block(qkv.reshape(b, t, 3 * d), x,
                               p["proj_w"], p["proj_b"],
                               num_heads=num_heads, scale=dh ** -0.5)  # (B, T, D)

    # --- MLP branch: x + fc2(gelu(fc1(norm2(x)))) --- (2 fused pallas_calls)
    x2 = x.reshape(b * t, d)
    h = fused_linear(x2, p["fc1_w"], p["fc1_b"],
                     ln=(p["ln2_g"], p["ln2_b"]), activation="gelu")
    x2 = fused_linear(h, p["fc2_w"], p["fc2_b"], residual=x2)
    return x2.reshape(b, t, d)


def vit_forward_features(x_nchw, params, *, patch, num_heads, no_embed_class):
    b, c, h, w = x_nchw.shape
    hp, wp = h // patch, w // patch
    n = hp * wp
    d = params["proj_w"].shape[1]

    # patchify (plain-JAX glue): NCHW -> (B, N, C*p*p), matching Conv2d weight
    # (D, C, p, p) flattened.  TODO(synk): fold into the embed kernel's index_map.
    patches = x_nchw.reshape(b, c, hp, patch, wp, patch)
    patches = patches.transpose(0, 2, 4, 1, 3, 5).reshape(b, n, c * patch * patch)

    # patch embedding (Conv2d with kernel==stride==patch) as a Pallas matmul
    x = fused_linear(patches.reshape(b * n, -1).astype(ACT_DTYPE),
                     params["proj_w"], params["proj_b"])
    x = x.reshape(b, n, d).astype(jnp.float32)

    # positional embedding + cls token (timm _pos_embed semantics), in f32
    cls = jnp.broadcast_to(params["cls_token"], (b, 1, d))
    if no_embed_class:
        x = x + params["pos_embed"]                           # pos_embed: (1, N, D)
        x = jnp.concatenate([cls, x], axis=1)
    else:
        x = jnp.concatenate([cls, x], axis=1)
        x = x + params["pos_embed"]                           # pos_embed: (1, N+1, D)
    x = x.astype(ACT_DTYPE)

    # pos_drop / attn_drop / proj_drop are identity at inference.
    for blk in params["blocks"]:
        x = transformer_block(x, blk, num_heads)

    # self.model.norm was deleted in PretrainedViT.__init__ -> no final norm.
    return x


# -----------------------------------------------------------------------------
# Deterministic parameter construction (synthetic "pretrained" weights)
# -----------------------------------------------------------------------------
def make_params(key, *, in_chans, patch, embed_dim, depth, num_heads,
                mlp_ratio, num_patches, no_embed_class):
    keys = jax.random.split(key, 4 + depth)
    std = 0.02
    params = {
        "proj_w": (std * jax.random.normal(
            keys[0], (in_chans * patch * patch, embed_dim), jnp.float32)).astype(WGT_DTYPE),
        "proj_b": jnp.zeros((embed_dim,), jnp.float32),
        "cls_token": std * jax.random.normal(keys[1], (1, 1, embed_dim), jnp.float32),
        "pos_embed": std * jax.random.normal(
            keys[2],
            (1, num_patches if no_embed_class else num_patches + 1, embed_dim),
            jnp.float32,
        ),
    }
    hidden = int(embed_dim * mlp_ratio)
    blocks = []
    for i in range(depth):
        bk = jax.random.split(keys[4 + i], 4)
        blocks.append({
            "ln1_g": jnp.ones((embed_dim,), jnp.float32),
            "ln1_b": jnp.zeros((embed_dim,), jnp.float32),
            "qkv_w": (std * jax.random.normal(
                bk[0], (embed_dim, 3 * embed_dim), jnp.float32)).astype(WGT_DTYPE),
            "qkv_b": jnp.zeros((3 * embed_dim,), jnp.float32),
            "proj_w": (std * jax.random.normal(
                bk[1], (embed_dim, embed_dim), jnp.float32)).astype(WGT_DTYPE),
            "proj_b": jnp.zeros((embed_dim,), jnp.float32),
            "ln2_g": jnp.ones((embed_dim,), jnp.float32),
            "ln2_b": jnp.zeros((embed_dim,), jnp.float32),
            "fc1_w": (std * jax.random.normal(
                bk[2], (embed_dim, hidden), jnp.float32)).astype(WGT_DTYPE),
            "fc1_b": jnp.zeros((hidden,), jnp.float32),
            "fc2_w": (std * jax.random.normal(
                bk[3], (hidden, embed_dim), jnp.float32)).astype(WGT_DTYPE),
            "fc2_b": jnp.zeros((embed_dim,), jnp.float32),
        })
    params["blocks"] = blocks
    return params


if __name__ == "__main__":
    # Small config consistent with the module's forward:
    #   channels=4, img_size=(16,16), patch=4 -> 16 patches, embed_dim=32,
    #   4 heads, mlp_ratio=4, cutoff_layer=2 trimmed blocks, no_class=False.
    B, C, H, W = 2, 4, 16, 16
    PATCH = 4
    EMBED = 32
    HEADS = 4
    DEPTH = 2            # cutoff_layer
    MLP_RATIO = 4.0
    NO_EMBED_CLASS = False
    NUM_PATCHES = (H // PATCH) * (W // PATCH)

    root = jax.random.PRNGKey(0)
    kx, kp = jax.random.split(root)
    x = jax.random.normal(kx, (B, C, H, W), jnp.float32)
    params = make_params(
        kp, in_chans=C, patch=PATCH, embed_dim=EMBED, depth=DEPTH,
        num_heads=HEADS, mlp_ratio=MLP_RATIO, num_patches=NUM_PATCHES,
        no_embed_class=NO_EMBED_CLASS,
    )

    out = vit_forward_features(
        x, params, patch=PATCH, num_heads=HEADS, no_embed_class=NO_EMBED_CLASS
    )
    out = jax.block_until_ready(out)
    assert out.shape == (B, NUM_PATCHES + 1, EMBED), out.shape
    assert jnp.all(jnp.isfinite(out.astype(jnp.float32)))
    print("KERNEL_OK")
</pallas_src>

<mosaic_0001>
module attributes {stable_mosaic.version = 11 : i64} {
  func.func @_fused_linear_kernel(%arg0: i32, %arg1: i32, %arg2: memref<32x64xbf16, #tpu.memory_space<vmem>>, %arg3: memref<64x32xbf16, #tpu.memory_space<vmem>>, %arg4: memref<1x32xf32, #tpu.memory_space<vmem>>, %arg5: memref<32x32xbf16, #tpu.memory_space<vmem>>, %arg6: memref<32x64xbf16, #tpu.memory_space<vmem>>) attributes {dimension_semantics = [#tpu.dimension_semantics<parallel>, #tpu.dimension_semantics<arbitrary>], iteration_bounds = array<i64: 1, 1>, scalar_prefetch = 0 : i64, scratch_operands = 1 : i64, tpu.core_type = #tpu.core_type<tc>, window_params = [{transform_indices = @transform_0, window_bounds = array<i64: 32, 64>}, {transform_indices = @transform_1, window_bounds = array<i64: 64, 32>}, {transform_indices = @transform_2, window_bounds = array<i64: 1, 32>}, {transform_indices = @transform_3, window_bounds = array<i64: 32, 32>}]} {
    %c0_i32 = arith.constant 0 : i32
    %0 = arith.cmpi eq, %arg1, %c0_i32 : i32
    %1 = arith.extui %0 : i1 to i32
    %c0_i32_0 = arith.constant 0 : i32
    %2 = arith.cmpi ne, %1, %c0_i32_0 : i32
    scf.if %2 {
      %c0_8 = arith.constant 0 : index
      %c0_9 = arith.constant 0 : index
      %11 = vector.load %arg2[%c0_8, %c0_9] : memref<32x64xbf16, #tpu.memory_space<vmem>>, vector<32x64xbf16>
      %12 = arith.extf %11 : vector<32x64xbf16> to vector<32x64xf32>
      %13 = arith.truncf %12 : vector<32x64xf32> to vector<32x64xbf16>
      %c0_10 = arith.constant 0 : index
      %c0_11 = arith.constant 0 : index
      %14 = vector.load %arg6[%c0_10, %c0_11] : memref<32x64xbf16, #tpu.memory_space<vmem>>, vector<32x64xbf16>
      tpu.vector_store %arg6[%c0_10, %c0_11], %13 {strides = array<i32>} : memref<32x64xbf16, #tpu.memory_space<vmem>>, vector<32x64xbf16>,
    } else {
    }
    %c0 = arith.constant 0 : index
    %c0_1 = arith.constant 0 : index
    %3 = vector.load %arg6[%c0, %c0_1] : memref<32x64xbf16, #tpu.memory_space<vmem>>, vector<32x64xbf16>
    %c0_2 = arith.constant 0 : index
    %c0_3 = arith.constant 0 : index
    %4 = vector.load %arg3[%c0_2, %c0_3] : memref<64x32xbf16, #tpu.memory_space<vmem>>, vector<64x32xbf16>
    %cst = arith.constant dense<0.000000e+00> : vector<32x32xf32>
    %5 = tpu.matmul %3, %4, %cst {dimension_numbers = #tpu.dot_dimension_numbers<[1], [0], [0], [1], [0, 0, 1, 1], [], []>} : vector<32x64xbf16>, vector<64x32xbf16>, vector<32x32xf32> -> vector<32x32xf32>
    %c0_4 = arith.constant 0 : index
    %c0_5 = arith.constant 0 : index
    %6 = vector.load %arg4[%c0_4, %c0_5] : memref<1x32xf32, #tpu.memory_space<vmem>>, vector<1x32xf32>
    %7 = vector.broadcast %6 : vector<1x32xf32> to vector<32x32xf32>
    %8 = arith.addf %5, %7 : vector<32x32xf32>
    %9 = arith.truncf %8 : vector<32x32xf32> to vector<32x32xbf16>
    %c0_6 = arith.constant 0 : index
    %c0_7 = arith.constant 0 : index
    %10 = vector.load %arg5[%c0_6, %c0_7] : memref<32x32xbf16, #tpu.memory_space<vmem>>, vector<32x32xbf16>
    tpu.vector_store %arg5[%c0_6, %c0_7], %9 {strides = array<i32>} : memref<32x32xbf16, #tpu.memory_space<vmem>>, vector<32x32xbf16>,
    return
  }
  func.func @transform_0(%arg0: i32, %arg1: i32) -> (i32, i32) {
    %c0_i32 = arith.constant 0 : i32
    %c0_i32_0 = arith.constant 0 : i32
    return %arg0, %c0_i32 : i32, i32
  }
  func.func @transform_1(%arg0: i32, %arg1: i32) -> (i32, i32) {
    %c0_i32 = arith.constant 0 : i32
    %c0_i32_0 = arith.constant 0 : i32
    return %c0_i32, %arg1 : i32, i32
  }
  func.func @transform_2(%arg0: i32, %arg1: i32) -> (i32, i32) {
    %c0_i32 = arith.constant 0 : i32
    %c0_i32_0 = arith.constant 0 : i32
    return %c0_i32, %arg1 : i32, i32
  }
  func.func @transform_3(%arg0: i32, %arg1: i32) -> (i32, i32) {
    %c0_i32 = arith.constant 0 : i32
    return %arg0, %arg1 : i32, i32
  }
}

</mosaic_0001>

<bundles_post_ra>
// kernel: tpu_custom_call.1
= control target key start
LH: loop header
LB: loop body
LE: loop exit
PB: predicated region body
PF: predicated region fallthrough
CT: control target
= control target key end

     0   :  { %vm36_vm0 = vcmask 523264   ;;  %s305_s0 = inlined_call_operand.vmem [shape: bf16[32,64], index: 0, kind: input, shape index: {}]   ;;  %s306_s1 = inlined_call_operand.vmem [shape: bf16[64,32], index: 1, kind: input, shape index: {}]   ;;  %s307_s2 = inlined_call_operand.vmem [shape: f32[1,32], index: 2, kind: input, shape index: {}]   ;;  %s308_s3 = inlined_call_operand.hbm [shape: bf16[32,32], index: 3, kind: output, shape index: {}]  }
   0x1   :  { %v211_v0 = vld [vmem:[%s306_s1] sm:$0xff]   ;;  %v212_v1 = vld [vmem:[%s306_s1 + $0x8] sm:$0xff]   ;;  %v213_v2 = vld [vmem:[%s306_s1 + $0x10] sm:$0xff]  }
   0x2   :  { %196 = vmatprep.subr.bf16.mxu0 %v211_v0  ;;  %v215_v3 = vld [vmem:[%s305_s0] sm:$0xff]   ;;  %v216_v4 = vld [vmem:[%s305_s0 + $0x8] sm:$0xff]  }
   0x3   :  { %197 = vmatpush3.bf16.msra.mxu0 %v211_v0 }
   0x4   :  { %198 = vmatprep.subr.bf16.mxu0 %v212_v1 }
   0x5   :  { %8 = vsyncpa [#allocation4], 0  ;;  %37 = vst.msk [vmem:[#allocation2] sm:$0xff] %vm36_vm0, %v215_v3  ;;  %v214_v5 = vld [vmem:[%s306_s1 + $0x18] sm:$0xff]   ;;  %v175_v8 = vld [vmem:[%s307_s2] ss:$0 sm:$0xff] }
   0x6   :  { %38 = vst.msk [vmem:[#allocation2 + $0x8] sm:$0xff] %vm36_vm0, %v216_v4  ;;  %vm152_vm1 = vcmask 257024   ;;  %s241_s1 = smov [#allocation3]  }
   0x7   :  { %199 = vmatpush3.bf16.msra.mxu0 %v212_v1  ;;  %s162_s25 = sshll.u32 %s241_s1, 4  ;;  %s163_s25 = int_to_ptr.vmem [resolvable:$true] %s162_s25 }
   0x8   :  { %200 = vmatprep.subr.bf16.mxu0 %v213_v2  ;;  %s217_s2 = scalar_lea.vmem %s163_s25, 256  ;;  %p222_p1 = scmp.lt.s32.totalorder %s163_s25, %s163_s25 }
   0x9   :  { %p218_p0 = scmp.ne.s32.totalorder %s163_s25, %s217_s2  ;;  %p223_p2 = scmp.lt.s32.totalorder %s217_s2, %s217_s2 }
   0xb   :  { %201 = vmatpush3.bf16.msra.mxu0 %v213_v2  ;;  %p224_p3 = por %p223_p2, %p222_p1 }
   0xc   :  { %202 = vmatprep.subr.bf16.mxu0 %v214_v5  ;;  %v39_v6 = vld [vmem:[#allocation2] sm:$0xff] }
   0xd   :  { %204 = vmatprep.mubr.msk.bf16.mxu0 %vm36_vm0, %v39_v6  ;;  %v40_v7 = vld [vmem:[#allocation2 + $0x8] sm:$0xff]  ;;  %p225_p4 = pnand %p224_p3, %p218_p0 }
   0xf   :  { %203 = vmatpush3.bf16.msra.mxu0 %v214_v5 }
  0x12   :  { %205 = vmatmul.mubr.msk.bf16.vlgmr.msra.gmra.mrb[0].mxu0 %vm36_vm0, %v40_v7 }
  0xe5   :  { %v206_v9 = vpop.f32.mrb[0].mxu0 }
  0xe6   :  { %v130_v10 = vadd.f32 %v206_v9, %v175_v8  ;;  %v121_v11 = vpop.f32.mrb[1].mxu0 }
  0xe7   :  { %v122_v12 = vadd.f32 %v175_v8, %v121_v11  ;;  %v207_v13 = vpop.f32.mrb[2].mxu0 }
  0xe8   :  { %v188_v14 = vpack.c.bf16 %v130_v10, %v130_v10  ;;  %v133_v15 = vadd.f32 %v207_v13, %v175_v8  ;;  %v124_v16 = vpop.f32.mrb[3].mxu0 }
  0xe9   :  { %v186_v17 = vpack.c.bf16 %v122_v12, %v122_v12  ;;  %v125_v18 = vadd.f32 %v175_v8, %v124_v16 }
  0xea   :  { %155 = vst.msk [vmem:[#allocation3 + $0x8] sm:$0xf] %vm152_vm1, %v188_v14  ;;  %v189_v19 = vpack.c.bf16 %v133_v15, %v133_v15 }
  0xeb   :  { %153 = vst.msk [vmem:[#allocation3] sm:$0xf] %vm152_vm1, %v186_v17  ;;  %v187_v20 = vpack.c.bf16 %v125_v18, %v125_v18 }
  0xec   :  { %156 = vst.msk [vmem:[#allocation3 + $0xc] sm:$0xf] %vm152_vm1, %v189_v19 }
  0xed   :  { %154 = vst.msk [vmem:[#allocation3 + $0x4] sm:$0xf] %vm152_vm1, %v187_v20 }
  0xee   :  { %228 = shalt.err (!%p225_p4)
}
  0xef   :  { %s229_s28 = scalar_lea.hbm %s308_s3, 256 }
  0xf0   :  { %p230_p5 = scmp.ne.s32.totalorder %s308_s3, %s229_s28  ;;  %p233_p6 = scmp.lt.u32.totalorder %s229_s28, %s308_s3 }
  0xf2   :  { %p235_p7 = pnand %p233_p6, %p230_p5 }
  0xf4   :  { %238 = shalt.err (!%p235_p7)
}
  0xf5   :  { %s242_s6 = smov 64   ;;  %s243_s7 = smov 4  }
  0xf6   :  { %168 = dma.vmem_to_hbm [thread:$0]  %s163_s25, 256, %s308_s3, [#allocation4], %s242_s6, %s242_s6, %s243_s7  }
  0xf7   :  { %239 = dma.done.wait [#allocation4], 256  }
  0xf8   :  { %240 = vsyncadd [#allocation4], 4294967040 }
  0xf9   :  { %172 = vsyncpa [#allocation4], 1 }

</bundles_post_ra>
